<compile_context>
chip_gen: v7x
topology: tpu7x:2x2x1
jax: 0.10.0
libtpu: 0.0.40
codegen_flags: <defaults>
</compile_context>

<pallas_src>
import functools

import jax
import jax.numpy as jnp
import numpy as np
from jax.experimental import pallas as pl
from jax.experimental.pallas import tpu as pltpu


def _gru_disc_kernel(seq_ref, wih_ref, whh_ref, bi_ref, bhn_ref,
                     wout_ref, bout_ref, out_ref, *, T, Bp, H):
    """Single-invocation fused-gate GRU + last-step dense + sigmoid.

    seq_ref : (T*Bp, D)  time-major sequence, batch padded to Bp=8 rows/step
    wih_ref : (D, 3H)    packed input->gate weights, lane order [r | z | n]
    whh_ref : (H, 3H)    packed hidden->gate weights, same lane order
    bi_ref  : (1, 3H)    b_ih (all gates) + [b_hh_r, b_hh_z, 0]  (pre-folded)
    bhn_ref : (1, H)     b_hh_n (must stay inside r * (h@W_hn + b_hn))
    wout_ref: (1, H)     dense1 weight (row layout)
    bout_ref: (1, 1)     dense1 bias
    out_ref : (Bp, 1)    sigmoid probabilities (wrapper slices the first B)
    """
    seq2d = seq_ref[...]                                   # (T*Bp, D)
    whh = whh_ref[...]                                     # (H, 3H)
    bhn = bhn_ref[...]                                     # (1, H)

    # Hoisted, fused input projection: one MXU pass for all gates of all
    # timesteps, with the r/z hidden biases already folded in.
    gi_all = (jnp.dot(seq2d, wih_ref[...], preferred_element_type=jnp.float32)
              + bi_ref[...])                               # (T*Bp, 3H)

    h = jnp.zeros((Bp, H), jnp.float32)                    # state=None -> zeros
    for t in range(T):                                     # static, fully unrolled
        # Bp == 8 -> each timestep is a whole sublane block: clean tile read.
        gi_t = gi_all[t * Bp:(t + 1) * Bp, :]              # (Bp, 3H)
        # Single fused hidden matmul per step (one MXU push/pop round-trip).
        gh = jnp.dot(h, whh, preferred_element_type=jnp.float32)   # (Bp, 3H)
        # r and z share one sigmoid launch on a lane-adjacent (Bp, 2H) tile.
        rz = jax.nn.sigmoid(gi_t[:, :2 * H] + gh[:, :2 * H])
        r = rz[:, :H]
        z = rz[:, H:]
        n = jnp.tanh(gi_t[:, 2 * H:] + r * (gh[:, 2 * H:] + bhn))
        h = (1.0 - z) * n + z * h

    # Final Linear(H -> 1): lane-wise multiply + cross-lane reduce (VPU/XLU),
    # avoiding an N=1 MXU matmul with a badly padded (H, 1) operand.
    logits = jnp.sum(h * wout_ref[...], axis=-1, keepdims=True) + bout_ref[...]
    out_ref[...] = jax.nn.sigmoid(logits).astype(out_ref.dtype)


@jax.jit
def discriminator_forward(seq, w_ih, w_hh, b_ih, b_hh, w_out, b_out):
    """seq: (T, B, D) float32, time-major. Returns (B, 1) probabilities."""
    T, B, D = seq.shape
    H = w_hh.shape[-1]
    Bp = max(8, ((B + 7) // 8) * 8)        # pad batch to full sublane blocks

    # Pack gates along lanes in [r | z | n] order (matches torch nn.GRU).
    wih_p = jnp.concatenate([w_ih[0], w_ih[1], w_ih[2]], axis=-1)      # (D, 3H)
    whh_p = jnp.concatenate([w_hh[0], w_hh[1], w_hh[2]], axis=-1)      # (H, 3H)
    # Fold b_hh[r], b_hh[z] into the prologue bias; b_hh[n] stays separate.
    bi_p = jnp.concatenate([b_ih[0] + b_hh[0],
                            b_ih[1] + b_hh[1],
                            b_ih[2]], axis=-1)                         # (1, 3H)
    bhn = b_hh[2]                                                      # (1, H)

    # Pad batch rows with zeros so each timestep owns a full 8-sublane block;
    # the padded rows compute garbage that is sliced away after the call.
    seq_p = jnp.pad(seq, ((0, 0), (0, Bp - B), (0, 0)))
    seq2d = seq_p.reshape(T * Bp, D)       # wrapper-side reshape (free XLA op)

    kernel = functools.partial(_gru_disc_kernel, T=T, Bp=Bp, H=H)
    vmem = pl.BlockSpec(memory_space=pltpu.MemorySpace.VMEM)

    # Gridless call: total footprint (~80 KB) fits VMEM on every generation
    # (incl. v7x's 64 MiB), so all operands load whole and the kernel runs once.
    # TODO(synk): for many-sequence batched inference on v7x, add a leading
    # "parallel" grid axis over sequence groups so both TensorCores are used.
    out = pl.pallas_call(
        kernel,
        out_shape=jax.ShapeDtypeStruct((Bp, 1), jnp.float32),
        in_specs=[vmem] * 7,
        out_specs=vmem,
    )(seq2d, wih_p, whh_p, bi_p, bhn, w_out, b_out)
    return out[:B]


def _reference_forward(seq, w_ih, w_hh, b_ih, b_hh, w_out, b_out):
    """Pure-JAX reference mirroring torch.nn.GRU + Linear + sigmoid."""
    T, B, D = seq.shape
    H = w_hh.shape[-1]
    h = jnp.zeros((B, H), jnp.float32)
    for t in range(T):
        x = seq[t]
        r = jax.nn.sigmoid(x @ w_ih[0] + b_ih[0] + h @ w_hh[0] + b_hh[0])
        z = jax.nn.sigmoid(x @ w_ih[1] + b_ih[1] + h @ w_hh[1] + b_hh[1])
        n = jnp.tanh(x @ w_ih[2] + b_ih[2] + r * (h @ w_hh[2] + b_hh[2]))
        h = (1.0 - z) * n + z * h
    return jax.nn.sigmoid(jnp.sum(h * w_out, axis=-1, keepdims=True) + b_out)


def init_params(key, input_size, hidden_size):
    """Deterministic init matching PyTorch shapes (uniform +-1/sqrt(H)),
    stored with the gate axis leading and matrices transposed to
    (in_features, out_features)."""
    H = hidden_size
    k = 1.0 / np.sqrt(H)
    keys = jax.random.split(key, 6)
    w_ih = jax.random.uniform(keys[0], (3, input_size, H), jnp.float32, -k, k)
    w_hh = jax.random.uniform(keys[1], (3, H, H), jnp.float32, -k, k)
    b_ih = jax.random.uniform(keys[2], (3, 1, H), jnp.float32, -k, k)
    b_hh = jax.random.uniform(keys[3], (3, 1, H), jnp.float32, -k, k)
    w_out = jax.random.uniform(keys[4], (1, H), jnp.float32, -k, k)
    b_out = jax.random.uniform(keys[5], (1, 1), jnp.float32, -k, k)
    return w_ih, w_hh, b_ih, b_hh, w_out, b_out


if __name__ == "__main__":
    # Module defaults: num_keypoints = 25 + 21 + 21 = 67 -> input_size = 134.
    NUM_KEYPOINTS = 25 + 21 + 21
    INPUT_SIZE = NUM_KEYPOINTS * 2      # 134
    HIDDEN_SIZE = 32
    T, B = 8, 2

    root = jax.random.PRNGKey(0)
    k_seq, k_par = jax.random.split(root)
    seq = jax.random.normal(k_seq, (T, B, INPUT_SIZE), jnp.float32)
    params = init_params(k_par, INPUT_SIZE, HIDDEN_SIZE)

    prob = discriminator_forward(seq, *params)
    prob = jax.block_until_ready(prob)

    ref = _reference_forward(seq, *params)
    assert prob.shape == (B, 1), prob.shape
    np.testing.assert_allclose(np.asarray(prob), np.asarray(ref),
                               rtol=1e-5, atol=1e-5)
    print("KERNEL_OK")
</pallas_src>

<mosaic_0001>
module attributes {stable_mosaic.version = 11 : i64} {
  func.func @_gru_disc_kernel(%arg0: memref<64x134xf32, #tpu.memory_space<vmem>>, %arg1: memref<134x96xf32, #tpu.memory_space<vmem>>, %arg2: memref<32x96xf32, #tpu.memory_space<vmem>>, %arg3: memref<1x96xf32, #tpu.memory_space<vmem>>, %arg4: memref<1x32xf32, #tpu.memory_space<vmem>>, %arg5: memref<1x32xf32, #tpu.memory_space<vmem>>, %arg6: memref<1x1xf32, #tpu.memory_space<vmem>>, %arg7: memref<8x1xf32, #tpu.memory_space<vmem>>) attributes {dimension_semantics = [], scalar_prefetch = 0 : i64, scratch_operands = 0 : i64, tpu.core_type = #tpu.core_type<tc>} {
    %c0 = arith.constant 0 : index
    %c0_0 = arith.constant 0 : index
    %0 = vector.load %arg0[%c0, %c0_0] : memref<64x134xf32, #tpu.memory_space<vmem>>, vector<64x134xf32>
    %c0_1 = arith.constant 0 : index
    %c0_2 = arith.constant 0 : index
    %1 = vector.load %arg2[%c0_1, %c0_2] : memref<32x96xf32, #tpu.memory_space<vmem>>, vector<32x96xf32>
    %c0_3 = arith.constant 0 : index
    %c0_4 = arith.constant 0 : index
    %2 = vector.load %arg4[%c0_3, %c0_4] : memref<1x32xf32, #tpu.memory_space<vmem>>, vector<1x32xf32>
    %c0_5 = arith.constant 0 : index
    %c0_6 = arith.constant 0 : index
    %3 = vector.load %arg1[%c0_5, %c0_6] : memref<134x96xf32, #tpu.memory_space<vmem>>, vector<134x96xf32>
    %cst = arith.constant dense<0.000000e+00> : vector<64x96xf32>
    %4 = tpu.matmul %0, %3, %cst {dimension_numbers = #tpu.dot_dimension_numbers<[1], [0], [0], [1], [0, 0, 1, 1], [], []>} : vector<64x134xf32>, vector<134x96xf32>, vector<64x96xf32> -> vector<64x96xf32>
    %c0_7 = arith.constant 0 : index
    %c0_8 = arith.constant 0 : index
    %5 = vector.load %arg3[%c0_7, %c0_8] : memref<1x96xf32, #tpu.memory_space<vmem>>, vector<1x96xf32>
    %6 = vector.broadcast %5 : vector<1x96xf32> to vector<64x96xf32>
    %7 = arith.addf %4, %6 : vector<64x96xf32>
    %cst_9 = arith.constant 0.000000e+00 : f32
    %8 = vector.broadcast %cst_9 : f32 to vector<8x32xf32>
    %9 = vector.extract_strided_slice %7 {offsets = [0, 0], sizes = [8, 96], strides = [1, 1]} : vector<64x96xf32> to vector<8x96xf32>
    %cst_10 = arith.constant dense<0.000000e+00> : vector<8x96xf32>
    %10 = tpu.matmul %8, %1, %cst_10 {dimension_numbers = #tpu.dot_dimension_numbers<[1], [0], [0], [1], [0, 0, 1, 1], [], []>} : vector<8x32xf32>, vector<32x96xf32>, vector<8x96xf32> -> vector<8x96xf32>
    %11 = vector.extract_strided_slice %9 {offsets = [0, 0], sizes = [8, 64], strides = [1, 1]} : vector<8x96xf32> to vector<8x64xf32>
    %12 = vector.extract_strided_slice %10 {offsets = [0, 0], sizes = [8, 64], strides = [1, 1]} : vector<8x96xf32> to vector<8x64xf32>
    %13 = arith.addf %11, %12 : vector<8x64xf32>
    %14 = arith.negf %13 : vector<8x64xf32>
    %15 = math.exp %14 : vector<8x64xf32>
    %cst_11 = arith.constant 1.000000e+00 : f32
    %16 = vector.broadcast %cst_11 : f32 to vector<8x64xf32>
    %17 = arith.addf %16, %15 : vector<8x64xf32>
    %18 = arith.divf %16, %17 : vector<8x64xf32>
    %19 = vector.extract_strided_slice %18 {offsets = [0, 0], sizes = [8, 32], strides = [1, 1]} : vector<8x64xf32> to vector<8x32xf32>
    %20 = vector.extract_strided_slice %18 {offsets = [0, 32], sizes = [8, 32], strides = [1, 1]} : vector<8x64xf32> to vector<8x32xf32>
    %21 = vector.extract_strided_slice %9 {offsets = [0, 64], sizes = [8, 32], strides = [1, 1]} : vector<8x96xf32> to vector<8x32xf32>
    %22 = vector.extract_strided_slice %10 {offsets = [0, 64], sizes = [8, 32], strides = [1, 1]} : vector<8x96xf32> to vector<8x32xf32>
    %23 = vector.broadcast %2 : vector<1x32xf32> to vector<8x32xf32>
    %24 = arith.addf %22, %23 : vector<8x32xf32>
    %25 = arith.mulf %19, %24 : vector<8x32xf32>
    %26 = arith.addf %21, %25 : vector<8x32xf32>
    %27 = math.tanh %26 : vector<8x32xf32>
    %cst_12 = arith.constant 1.000000e+00 : f32
    %28 = vector.broadcast %cst_12 : f32 to vector<8x32xf32>
    %29 = arith.subf %28, %20 : vector<8x32xf32>
    %30 = arith.mulf %29, %27 : vector<8x32xf32>
    %31 = arith.mulf %20, %8 : vector<8x32xf32>
    %32 = arith.addf %30, %31 : vector<8x32xf32>
    %33 = vector.extract_strided_slice %7 {offsets = [8, 0], sizes = [8, 96], strides = [1, 1]} : vector<64x96xf32> to vector<8x96xf32>
    %cst_13 = arith.constant dense<0.000000e+00> : vector<8x96xf32>
    %34 = tpu.matmul %32, %1, %cst_13 {dimension_numbers = #tpu.dot_dimension_numbers<[1], [0], [0], [1], [0, 0, 1, 1], [], []>} : vector<8x32xf32>, vector<32x96xf32>, vector<8x96xf32> -> vector<8x96xf32>
    %35 = vector.extract_strided_slice %33 {offsets = [0, 0], sizes = [8, 64], strides = [1, 1]} : vector<8x96xf32> to vector<8x64xf32>
    %36 = vector.extract_strided_slice %34 {offsets = [0, 0], sizes = [8, 64], strides = [1, 1]} : vector<8x96xf32> to vector<8x64xf32>
    %37 = arith.addf %35, %36 : vector<8x64xf32>
    %38 = arith.negf %37 : vector<8x64xf32>
    %39 = math.exp %38 : vector<8x64xf32>
    %cst_14 = arith.constant 1.000000e+00 : f32
    %40 = vector.broadcast %cst_14 : f32 to vector<8x64xf32>
    %41 = arith.addf %40, %39 : vector<8x64xf32>
    %42 = arith.divf %40, %41 : vector<8x64xf32>
    %43 = vector.extract_strided_slice %42 {offsets = [0, 0], sizes = [8, 32], strides = [1, 1]} : vector<8x64xf32> to vector<8x32xf32>
    %44 = vector.extract_strided_slice %42 {offsets = [0, 32], sizes = [8, 32], strides = [1, 1]} : vector<8x64xf32> to vector<8x32xf32>
    %45 = vector.extract_strided_slice %33 {offsets = [0, 64], sizes = [8, 32], strides = [1, 1]} : vector<8x96xf32> to vector<8x32xf32>
    %46 = vector.extract_strided_slice %34 {offsets = [0, 64], sizes = [8, 32], strides = [1, 1]} : vector<8x96xf32> to vector<8x32xf32>
    %47 = vector.broadcast %2 : vector<1x32xf32> to vector<8x32xf32>
    %48 = arith.addf %46, %47 : vector<8x32xf32>
    %49 = arith.mulf %43, %48 : vector<8x32xf32>
    %50 = arith.addf %45, %49 : vector<8x32xf32>
    %51 = math.tanh %50 : vector<8x32xf32>
    %cst_15 = arith.constant 1.000000e+00 : f32
    %52 = vector.broadcast %cst_15 : f32 to vector<8x32xf32>
    %53 = arith.subf %52, %44 : vector<8x32xf32>
    %54 = arith.mulf %53, %51 : vector<8x32xf32>
    %55 = arith.mulf %44, %32 : vector<8x32xf32>
    %56 = arith.addf %54, %55 : vector<8x32xf32>
    %57 = vector.extract_strided_slice %7 {offsets = [16, 0], sizes = [8, 96], strides = [1, 1]} : vector<64x96xf32> to vector<8x96xf32>
    %cst_16 = arith.constant dense<0.000000e+00> : vector<8x96xf32>
    %58 = tpu.matmul %56, %1, %cst_16 {dimension_numbers = #tpu.dot_dimension_numbers<[1], [0], [0], [1], [0, 0, 1, 1], [], []>} : vector<8x32xf32>, vector<32x96xf32>, vector<8x96xf32> -> vector<8x96xf32>
    %59 = vector.extract_strided_slice %57 {offsets = [0, 0], sizes = [8, 64], strides = [1, 1]} : vector<8x96xf32> to vector<8x64xf32>
    %60 = vector.extract_strided_slice %58 {offsets = [0, 0], sizes = [8, 64], strides = [1, 1]} : vector<8x96xf32> to vector<8x64xf32>
    %61 = arith.addf %59, %60 : vector<8x64xf32>
    %62 = arith.negf %61 : vector<8x64xf32>
    %63 = math.exp %62 : vector<8x64xf32>
    %cst_17 = arith.constant 1.000000e+00 : f32
    %64 = vector.broadcast %cst_17 : f32 to vector<8x64xf32>
    %65 = arith.addf %64, %63 : vector<8x64xf32>
    %66 = arith.divf %64, %65 : vector<8x64xf32>
    %67 = vector.extract_strided_slice %66 {offsets = [0, 0], sizes = [8, 32], strides = [1, 1]} : vector<8x64xf32> to vector<8x32xf32>
    %68 = vector.extract_strided_slice %66 {offsets = [0, 32], sizes = [8, 32], strides = [1, 1]} : vector<8x64xf32> to vector<8x32xf32>
    %69 = vector.extract_strided_slice %57 {offsets = [0, 64], sizes = [8, 32], strides = [1, 1]} : vector<8x96xf32> to vector<8x32xf32>
    %70 = vector.extract_strided_slice %58 {offsets = [0, 64], sizes = [8, 32], strides = [1, 1]} : vector<8x96xf32> to vector<8x32xf32>
    %71 = vector.broadcast %2 : vector<1x32xf32> to vector<8x32xf32>
    %72 = arith.addf %70, %71 : vector<8x32xf32>
    %73 = arith.mulf %67, %72 : vector<8x32xf32>
    %74 = arith.addf %69, %73 : vector<8x32xf32>
    %75 = math.tanh %74 : vector<8x32xf32>
    %cst_18 = arith.constant 1.000000e+00 : f32
    %76 = vector.broadcast %cst_18 : f32 to vector<8x32xf32>
    %77 = arith.subf %76, %68 : vector<8x32xf32>
    %78 = arith.mulf %77, %75 : vector<8x32xf32>
    %79 = arith.mulf %68, %56 : vector<8x32xf32>
    %80 = arith.addf %78, %79 : vector<8x32xf32>
    %81 = vector.extract_strided_slice %7 {offsets = [24, 0], sizes = [8, 96], strides = [1, 1]} : vector<64x96xf32> to vector<8x96xf32>
    %cst_19 = arith.constant dense<0.000000e+00> : vector<8x96xf32>
    %82 = tpu.matmul %80, %1, %cst_19 {dimension_numbers = #tpu.dot_dimension_numbers<[1], [0], [0], [1], [0, 0, 1, 1], [], []>} : vector<8x32xf32>, vector<32x96xf32>, vector<8x96xf32> -> vector<8x96xf32>
    %83 = vector.extract_strided_slice %81 {offsets = [0, 0], sizes = [8, 64], strides = [1, 1]} : vector<8x96xf32> to vector<8x64xf32>
    %84 = vector.extract_strided_slice %82 {offsets = [0, 0], sizes = [8, 64], strides = [1, 1]} : vector<8x96xf32> to vector<8x64xf32>
    %85 = arith.addf %83, %84 : vector<8x64xf32>
    %86 = arith.negf %85 : vector<8x64xf32>
    %87 = math.exp %86 : vector<8x64xf32>
    %cst_20 = arith.constant 1.000000e+00 : f32
    %88 = vector.broadcast %cst_20 : f32 to vector<8x64xf32>
    %89 = arith.addf %88, %87 : vector<8x64xf32>
    %90 = arith.divf %88, %89 : vector<8x64xf32>
    %91 = vector.extract_strided_slice %90 {offsets = [0, 0], sizes = [8, 32], strides = [1, 1]} : vector<8x64xf32> to vector<8x32xf32>
    %92 = vector.extract_strided_slice %90 {offsets = [0, 32], sizes = [8, 32], strides = [1, 1]} : vector<8x64xf32> to vector<8x32xf32>
    %93 = vector.extract_strided_slice %81 {offsets = [0, 64], sizes = [8, 32], strides = [1, 1]} : vector<8x96xf32> to vector<8x32xf32>
    %94 = vector.extract_strided_slice %82 {offsets = [0, 64], sizes = [8, 32], strides = [1, 1]} : vector<8x96xf32> to vector<8x32xf32>
    %95 = vector.broadcast %2 : vector<1x32xf32> to vector<8x32xf32>
    %96 = arith.addf %94, %95 : vector<8x32xf32>
    %97 = arith.mulf %91, %96 : vector<8x32xf32>
    %98 = arith.addf %93, %97 : vector<8x32xf32>
    %99 = math.tanh %98 : vector<8x32xf32>
    %cst_21 = arith.constant 1.000000e+00 : f32
    %100 = vector.broadcast %cst_21 : f32 to vector<8x32xf32>
    %101 = arith.subf %100, %92 : vector<8x32xf32>
    %102 = arith.mulf %101, %99 : vector<8x32xf32>
    %103 = arith.mulf %92, %80 : vector<8x32xf32>
    %104 = arith.addf %102, %103 : vector<8x32xf32>
    %105 = vector.extract_strided_slice %7 {offsets = [32, 0], sizes = [8, 96], strides = [1, 1]} : vector<64x96xf32> to vector<8x96xf32>
    %cst_22 = arith.constant dense<0.000000e+00> : vector<8x96xf32>
    %106 = tpu.matmul %104, %1, %cst_22 {dimension_numbers = #tpu.dot_dimension_numbers<[1], [0], [0], [1], [0, 0, 1, 1], [], []>} : vector<8x32xf32>, vector<32x96xf32>, vector<8x96xf32> -> vector<8x96xf32>
    %107 = vector.extract_strided_slice %105 {offsets = [0, 0], sizes = [8, 64], strides = [1, 1]} : vector<8x96xf32> to vector<8x64xf32>
    %108 = vector.extract_strided_slice %106 {offsets = [0, 0], sizes = [8, 64], strides = [1, 1]} : vector<8x96xf32> to vector<8x64xf32>
    %109 = arith.addf %107, %108 : vector<8x64xf32>
    %110 = arith.negf %109 : vector<8x64xf32>
    %111 = math.exp %110 : vector<8x64xf32>
    %cst_23 = arith.constant 1.000000e+00 : f32
    %112 = vector.broadcast %cst_23 : f32 to vector<8x64xf32>
    %113 = arith.addf %112, %111 : vector<8x64xf32>
    %114 = arith.divf %112, %113 : vector<8x64xf32>
    %115 = vector.extract_strided_slice %114 {offsets = [0, 0], sizes = [8, 32], strides = [1, 1]} : vector<8x64xf32> to vector<8x32xf32>
    %116 = vector.extract_strided_slice %114 {offsets = [0, 32], sizes = [8, 32], strides = [1, 1]} : vector<8x64xf32> to vector<8x32xf32>
    %117 = vector.extract_strided_slice %105 {offsets = [0, 64], sizes = [8, 32], strides = [1, 1]} : vector<8x96xf32> to vector<8x32xf32>
    %118 = vector.extract_strided_slice %106 {offsets = [0, 64], sizes = [8, 32], strides = [1, 1]} : vector<8x96xf32> to vector<8x32xf32>
    %119 = vector.broadcast %2 : vector<1x32xf32> to vector<8x32xf32>
    %120 = arith.addf %118, %119 : vector<8x32xf32>
    %121 = arith.mulf %115, %120 : vector<8x32xf32>
    %122 = arith.addf %117, %121 : vector<8x32xf32>
    %123 = math.tanh %122 : vector<8x32xf32>
    %cst_24 = arith.constant 1.000000e+00 : f32
    %124 = vector.broadcast %cst_24 : f32 to vector<8x32xf32>
    %125 = arith.subf %124, %116 : vector<8x32xf32>
    %126 = arith.mulf %125, %123 : vector<8x32xf32>
    %127 = arith.mulf %116, %104 : vector<8x32xf32>
    %128 = arith.addf %126, %127 : vector<8x32xf32>
    %129 = vector.extract_strided_slice %7 {offsets = [40, 0], sizes = [8, 96], strides = [1, 1]} : vector<64x96xf32> to vector<8x96xf32>
    %cst_25 = arith.constant dense<0.000000e+00> : vector<8x96xf32>
    %130 = tpu.matmul %128, %1, %cst_25 {dimension_numbers = #tpu.dot_dimension_numbers<[1], [0], [0], [1], [0, 0, 1, 1], [], []>} : vector<8x32xf32>, vector<32x96xf32>, vector<8x96xf32> -> vector<8x96xf32>
    %131 = vector.extract_strided_slice %129 {offsets = [0, 0], sizes = [8, 64], strides = [1, 1]} : vector<8x96xf32> to vector<8x64xf32>
    %132 = vector.extract_strided_slice %130 {offsets = [0, 0], sizes = [8, 64], strides = [1, 1]} : vector<8x96xf32> to vector<8x64xf32>
    %133 = arith.addf %131, %132 : vector<8x64xf32>
    %134 = arith.negf %133 : vector<8x64xf32>
    %135 = math.exp %134 : vector<8x64xf32>
    %cst_26 = arith.constant 1.000000e+00 : f32
    %136 = vector.broadcast %cst_26 : f32 to vector<8x64xf32>
    %137 = arith.addf %136, %135 : vector<8x64xf32>
    %138 = arith.divf %136, %137 : vector<8x64xf32>
    %139 = vector.extract_strided_slice %138 {offsets = [0, 0], sizes = [8, 32], strides = [1, 1]} : vector<8x64xf32> to vector<8x32xf32>
    %140 = vector.extract_strided_slice %138 {offsets = [0, 32], sizes = [8, 32], strides = [1, 1]} : vector<8x64xf32> to vector<8x32xf32>
    %141 = vector.extract_strided_slice %129 {offsets = [0, 64], sizes = [8, 32], strides = [1, 1]} : vector<8x96xf32> to vector<8x32xf32>
    %142 = vector.extract_strided_slice %130 {offsets = [0, 64], sizes = [8, 32], strides = [1, 1]} : vector<8x96xf32> to vector<8x32xf32>
    %143 = vector.broadcast %2 : vector<1x32xf32> to vector<8x32xf32>
    %144 = arith.addf %142, %143 : vector<8x32xf32>
    %145 = arith.mulf %139, %144 : vector<8x32xf32>
    %146 = arith.addf %141, %145 : vector<8x32xf32>
    %147 = math.tanh %146 : vector<8x32xf32>
    %cst_27 = arith.constant 1.000000e+00 : f32
    %148 = vector.broadcast %cst_27 : f32 to vector<8x32xf32>
    %149 = arith.subf %148, %140 : vector<8x32xf32>
    %150 = arith.mulf %149, %147 : vector<8x32xf32>
    %151 = arith.mulf %140, %128 : vector<8x32xf32>
    %152 = arith.addf %150, %151 : vector<8x32xf32>
    %153 = vector.extract_strided_slice %7 {offsets = [48, 0], sizes = [8, 96], strides = [1, 1]} : vector<64x96xf32> to vector<8x96xf32>
    %cst_28 = arith.constant dense<0.000000e+00> : vector<8x96xf32>
    %154 = tpu.matmul %152, %1, %cst_28 {dimension_numbers = #tpu.dot_dimension_numbers<[1], [0], [0], [1], [0, 0, 1, 1], [], []>} : vector<8x32xf32>, vector<32x96xf32>, vector<8x96xf32> -> vector<8x96xf32>
    %155 = vector.extract_strided_slice %153 {offsets = [0, 0], sizes = [8, 64], strides = [1, 1]} : vector<8x96xf32> to vector<8x64xf32>
    %156 = vector.extract_strided_slice %154 {offsets = [0, 0], sizes = [8, 64], strides = [1, 1]} : vector<8x96xf32> to vector<8x64xf32>
    %157 = arith.addf %155, %156 : vector<8x64xf32>
    %158 = arith.negf %157 : vector<8x64xf32>
    %159 = math.exp %158 : vector<8x64xf32>
    %cst_29 = arith.constant 1.000000e+00 : f32
    %160 = vector.broadcast %cst_29 : f32 to vector<8x64xf32>
    %161 = arith.addf %160, %159 : vector<8x64xf32>
    %162 = arith.divf %160, %161 : vector<8x64xf32>
    %163 = vector.extract_strided_slice %162 {offsets = [0, 0], sizes = [8, 32], strides = [1, 1]} : vector<8x64xf32> to vector<8x32xf32>
    %164 = vector.extract_strided_slice %162 {offsets = [0, 32], sizes = [8, 32], strides = [1, 1]} : vector<8x64xf32> to vector<8x32xf32>
    %165 = vector.extract_strided_slice %153 {offsets = [0, 64], sizes = [8, 32], strides = [1, 1]} : vector<8x96xf32> to vector<8x32xf32>
    %166 = vector.extract_strided_slice %154 {offsets = [0, 64], sizes = [8, 32], strides = [1, 1]} : vector<8x96xf32> to vector<8x32xf32>
    %167 = vector.broadcast %2 : vector<1x32xf32> to vector<8x32xf32>
    %168 = arith.addf %166, %167 : vector<8x32xf32>
    %169 = arith.mulf %163, %168 : vector<8x32xf32>
    %170 = arith.addf %165, %169 : vector<8x32xf32>
    %171 = math.tanh %170 : vector<8x32xf32>
    %cst_30 = arith.constant 1.000000e+00 : f32
    %172 = vector.broadcast %cst_30 : f32 to vector<8x32xf32>
    %173 = arith.subf %172, %164 : vector<8x32xf32>
    %174 = arith.mulf %173, %171 : vector<8x32xf32>
    %175 = arith.mulf %164, %152 : vector<8x32xf32>
    %176 = arith.addf %174, %175 : vector<8x32xf32>
    %177 = vector.extract_strided_slice %7 {offsets = [56, 0], sizes = [8, 96], strides = [1, 1]} : vector<64x96xf32> to vector<8x96xf32>
    %cst_31 = arith.constant dense<0.000000e+00> : vector<8x96xf32>
    %178 = tpu.matmul %176, %1, %cst_31 {dimension_numbers = #tpu.dot_dimension_numbers<[1], [0], [0], [1], [0, 0, 1, 1], [], []>} : vector<8x32xf32>, vector<32x96xf32>, vector<8x96xf32> -> vector<8x96xf32>
    %179 = vector.extract_strided_slice %177 {offsets = [0, 0], sizes = [8, 64], strides = [1, 1]} : vector<8x96xf32> to vector<8x64xf32>
    %180 = vector.extract_strided_slice %178 {offsets = [0, 0], sizes = [8, 64], strides = [1, 1]} : vector<8x96xf32> to vector<8x64xf32>
    %181 = arith.addf %179, %180 : vector<8x64xf32>
    %182 = arith.negf %181 : vector<8x64xf32>
    %183 = math.exp %182 : vector<8x64xf32>
    %cst_32 = arith.constant 1.000000e+00 : f32
    %184 = vector.broadcast %cst_32 : f32 to vector<8x64xf32>
    %185 = arith.addf %184, %183 : vector<8x64xf32>
    %186 = arith.divf %184, %185 : vector<8x64xf32>
    %187 = vector.extract_strided_slice %186 {offsets = [0, 0], sizes = [8, 32], strides = [1, 1]} : vector<8x64xf32> to vector<8x32xf32>
    %188 = vector.extract_strided_slice %186 {offsets = [0, 32], sizes = [8, 32], strides = [1, 1]} : vector<8x64xf32> to vector<8x32xf32>
    %189 = vector.extract_strided_slice %177 {offsets = [0, 64], sizes = [8, 32], strides = [1, 1]} : vector<8x96xf32> to vector<8x32xf32>
    %190 = vector.extract_strided_slice %178 {offsets = [0, 64], sizes = [8, 32], strides = [1, 1]} : vector<8x96xf32> to vector<8x32xf32>
    %191 = vector.broadcast %2 : vector<1x32xf32> to vector<8x32xf32>
    %192 = arith.addf %190, %191 : vector<8x32xf32>
    %193 = arith.mulf %187, %192 : vector<8x32xf32>
    %194 = arith.addf %189, %193 : vector<8x32xf32>
    %195 = math.tanh %194 : vector<8x32xf32>
    %cst_33 = arith.constant 1.000000e+00 : f32
    %196 = vector.broadcast %cst_33 : f32 to vector<8x32xf32>
    %197 = arith.subf %196, %188 : vector<8x32xf32>
    %198 = arith.mulf %197, %195 : vector<8x32xf32>
    %199 = arith.mulf %188, %176 : vector<8x32xf32>
    %200 = arith.addf %198, %199 : vector<8x32xf32>
    %c0_34 = arith.constant 0 : index
    %c0_35 = arith.constant 0 : index
    %201 = vector.load %arg5[%c0_34, %c0_35] : memref<1x32xf32, #tpu.memory_space<vmem>>, vector<1x32xf32>
    %202 = vector.broadcast %201 : vector<1x32xf32> to vector<8x32xf32>
    %203 = arith.mulf %200, %202 : vector<8x32xf32>
    %cst_36 = arith.constant dense<0.000000e+00> : vector<8xf32>
    %204 = vector.multi_reduction <add>, %203, %cst_36 [1] : vector<8x32xf32> to vector<8xf32>
    %205 = vector.shape_cast %204 : vector<8xf32> to vector<8x1xf32>
    %c0_37 = arith.constant 0 : index
    %c0_38 = arith.constant 0 : index
    %206 = vector.load %arg6[%c0_37, %c0_38] : memref<1x1xf32, #tpu.memory_space<vmem>>, vector<1x1xf32>
    %207 = vector.broadcast %206 : vector<1x1xf32> to vector<8x1xf32>
    %208 = arith.addf %205, %207 : vector<8x1xf32>
    %209 = arith.negf %208 : vector<8x1xf32>
    %210 = math.exp %209 : vector<8x1xf32>
    %cst_39 = arith.constant 1.000000e+00 : f32
    %211 = vector.broadcast %cst_39 : f32 to vector<8x1xf32>
    %212 = arith.addf %211, %210 : vector<8x1xf32>
    %213 = arith.divf %211, %212 : vector<8x1xf32>
    %c0_40 = arith.constant 0 : index
    %c0_41 = arith.constant 0 : index
    %214 = vector.load %arg7[%c0_40, %c0_41] : memref<8x1xf32, #tpu.memory_space<vmem>>, vector<8x1xf32>
    tpu.vector_store %arg7[%c0_40, %c0_41], %213 {strides = array<i32>} : memref<8x1xf32, #tpu.memory_space<vmem>>, vector<8x1xf32>,
    return
  }
}

</mosaic_0001>

<bundles_post_ra>
// kernel: discriminator_forward.1
= control target key start
LH: loop header
LB: loop body
LE: loop exit
PB: predicated region body
PF: predicated region fallthrough
CT: control target
= control target key end

     0   :  { %v1354_v0 = vmov 0.0|0.0   ;;  %vm1355_vm0 = vmmov 0   ;;  %v1356_v8 = vmov 0.0   ;;  %vm73_vm1 = vcmask 48128   ;;  %s1357_s28 = smov 64   ;;  %s1359_s29 = smov 32   ;;  %s1657_s1 = inlined_call_operand.vmem [shape: f32[134,96], index: 1, kind: input, shape index: {}]   ;;  %s1658_s2 = inlined_call_operand.vmem [shape: f32[32,96], index: 2, kind: input, shape index: {}]   ;;  %s1659_s0 = inlined_call_operand.vmem [shape: f32[64,134], index: 0, kind: input, shape index: {}]   ;;  %s1660_s4 = inlined_call_operand.vmem [shape: f32[1,32], index: 4, kind: input, shape index: {}]   ;;  %s1661_s3 = inlined_call_operand.vmem [shape: f32[1,96], index: 3, kind: input, shape index: {}]   ;;  %s1662_s5 = inlined_call_operand.vmem [shape: f32[1,32], index: 5, kind: input, shape index: {}]   ;;  %s1663_s6 = inlined_call_operand.<no memory space> [shape: f32[1,1], index: 6, kind: input, shape index: {}]   ;;  %s1664_s7 = inlined_call_operand.vmem [shape: f32[8,1], index: 7, kind: output, shape index: {}]  }
   0x1   :  { %1224 = vmatprep.subr.bf16.mxu0 %v1354_v0  ;;  %1248 = vmatprep.subr.bf16.mxu1 %v1354_v0  ;;  %v49_v1 = vld [vmem:[%s1657_s1] sm:$0xff]  ;;  %v50_v2 = vld [vmem:[%s1657_s1 + $0x8] sm:$0xff]  ;;  %v51_v6 = vld [vmem:[%s1657_s1 + $0x10] sm:$0xff]  ;;  %vm98_vm2 = vcmask 1045504   ;;  %vm207_vm3 = vcmask 261120   ;;  %vm1061_vm4 = vcmask 7168  }
   0x2   :  { %v44_v3 = vld [vmem:[%s1658_s2] sm:$0xff]  ;;  %v1225_v4 = vpack.c.bf16 %v50_v2, %v49_v1  ;;  %v45_v5 = vld [vmem:[%s1658_s2 + $0x8] sm:$0xff]  ;;  %v52_v7 = vld [vmem:[%s1657_s1 + $0x18] sm:$0xff]  ;;  %1144 = vmatprep.mubr.msk.f32.mxu1 %vm1355_vm0, %v1356_v8 }
   0x3   :  { %v1422_v9 = vpack.c.bf16 %v45_v5, %v44_v3  ;;  %v46_v10 = vld [vmem:[%s1658_s2 + $0x10] sm:$0xff]  ;;  %v47_v11 = vld [vmem:[%s1658_s2 + $0x18] sm:$0xff]  ;;  %v1228_v12 = vpack.c.bf16 %v52_v7, %v51_v6  ;;  %v53_v14 = vld [vmem:[%s1657_s1 + $0x20] sm:$0xff] }
   0x4   :  { %1226 = vmatpush1.bf16.msra.mxu0 %v1225_v4  ;;  %v1432_v13 = vpack.c.bf16 %v47_v11, %v46_v10  ;;  %v54_v15 = vld [vmem:[%s1657_s1 + $0x28] sm:$0xff]  ;;  %v1078_v18 = vld [vmem:[%s1660_s4] ss:$0 sm:$0xff]  ;;  %v55_v19 = vld [vmem:[%s1657_s1 + $0x30] sm:$0xff]  ;;  %s1358_s4 = smov 96  }
   0x5   :  { %1250 = vmatpush3.bf16.msra.mxu1 %v1422_v9  ;;  %1227 = vmatprep.subr.bf16.mxu0 %v1354_v0  ;;  %v1231_v16 = vpack.c.bf16 %v54_v15, %v53_v14  ;;  %v29_v17 = vld [vmem:[%s1659_s0 + $0x8] sm:$0xff]  ;;  %v56_v20 = vld [vmem:[%s1657_s1 + $0x38] sm:$0xff]  ;;  %v57_v22 = vld [vmem:[%s1657_s1 + $0x40] sm:$0xff] }
   0x6   :  { %1251 = vmatprep.subr.bf16.mxu1 %v1354_v0  ;;  %1069 = vmatprep.mubr.msk.f32.mxu0 %vm73_vm1, %v29_v17  ;;  %v1234_v21 = vpack.c.bf16 %v56_v20, %v55_v19  ;;  %v58_v23 = vld [vmem:[%s1657_s1 + $0x48] sm:$0xff]  ;;  %v59_v25 = vld [vmem:[%s1657_s1 + $0x50] sm:$0xff]  ;;  %v60_v26 = vld [vmem:[%s1657_s1 + $0x58] sm:$0xff] }
   0x7   :  { %293 = vrot.lane.b32.xlu0 %v1078_v18, %s1357_s28  ;;  %v1237_v24 = vpack.c.bf16 %v58_v23, %v57_v22  ;;  %v1240_v27 = vpack.c.bf16 %v60_v26, %v59_v25  ;;  %v61_v28 = vld [vmem:[%s1657_s1 + $0x60] sm:$0xff]  ;;  %v62_v29 = vld [vmem:[%s1657_s1 + $0x68] sm:$0xff]  ;;  %v63_v31 = vld [vmem:[%s1657_s1 + $0x70] sm:$0xff] }
   0x8   :  { %1229 = vmatpush1.bf16.msra.mxu0 %v1228_v12  ;;  %v1243_v30 = vpack.c.bf16 %v62_v29, %v61_v28  ;;  %v64_v32 = vld [vmem:[%s1657_s1 + $0x78] sm:$0xff]  ;;  %v65_v34 = vld [vmem:[%s1657_s1 + $0x80] sm:$0x3f]  ;;  %v30_v54 = vld [vmem:[%s1659_s0 + $0x10] sm:$0xff] }
   0x9   :  { %1253 = vmatpush3.bf16.msra.mxu1 %v1432_v13  ;;  %1230 = vmatprep.subr.bf16.mxu0 %v1354_v0  ;;  %v1246_v33 = vpack.c.bf16 %v64_v32, %v63_v31  ;;  %v28_v35 = vld [vmem:[%s1659_s0] sm:$0xff]  ;;  %v31_v53 = vld [vmem:[%s1659_s0 + $0x18] sm:$0xff]  ;;  %v33_v17 = vld [vmem:[%s1659_s0 + $0x28] sm:$0xff] }
   0xa   :  { %1254 = vmatprep.subr.bf16.mxu1 %v1354_v0  ;;  %v1508_v42 = vld [vmem:[%s1661_s3] ss:$0 sm:$0xff] }
   0xb   :  { %v32_v18 = vld [vmem:[%s1659_s0 + $0x20] sm:$0xff] }
   0xc   :  { %1145 = vmatmul.mubr.f32.vlgmr.msra.gmra.mrb[0].mxu1 %v1356_v8  ;;  %1232 = vmatpush1.bf16.msra.mxu0 %v1231_v16 }
   0xd   :  { %1233 = vmatprep.subr.bf16.mxu0 %v1354_v0  ;;  %1256 = vmatpush3.bf16.msra.mxu1 %v1422_v9 }
   0xe   :  { %1257 = vmatprep.subr.bf16.mxu1 %v1354_v0  ;;  %1155 = vmatprep.mubr.msk.f32.mxu1 %vm1355_vm0, %v1356_v8 }
  0x10   :  { %1235 = vmatpush1.bf16.msra.mxu0 %v1234_v21 }
  0x11   :  { %1236 = vmatprep.subr.bf16.mxu0 %v1354_v0  ;;  %1259 = vmatpush3.bf16.msra.mxu1 %v1432_v13 }
  0x12   :  { %1260 = vmatprep.subr.bf16.mxu1 %v1354_v0 }
  0x14   :  { %1238 = vmatpush1.bf16.msra.mxu0 %v1237_v24 }
  0x15   :  { %1239 = vmatprep.subr.bf16.mxu0 %v1354_v0 }
  0x18   :  { %1241 = vmatpush1.bf16.msra.mxu0 %v1240_v27 }
  0x19   :  { %1242 = vmatprep.subr.bf16.mxu0 %v1354_v0 }
  0x1c   :  { %1244 = vmatpush1.bf16.msra.mxu0 %v1243_v30 }
  0x1d   :  { %1245 = vmatprep.subr.bf16.mxu0 %v1354_v0 }
  0x20   :  { %1247 = vmatpush1.bf16.msra.mxu0 %v1246_v33 }
  0x21   :  { %134 = vmatprep.subr.mxu0 %v1356_v8 }
  0x24   :  { %1068 = vmatpush1.msk.msra.mxu0 %vm98_vm2, %v65_v34 }
  0x25   :  { %167 = vmatmul.mubr.f32.vlgmr.msra.gmra.mrb[0].mxu0 %v28_v35 }
  0x26   :  { %1070 = vmatprep.mubr.msk.f32.mxu0 %vm73_vm1, %v31_v53 }
  0x29   :  { %172 = vmatmul.mubr.f32.gmra.mrb[2].mxu0 %v30_v54 }
  0x2a   :  { %1071 = vmatprep.mubr.msk.f32.mxu0 %vm73_vm1, %v33_v17 }
  0x2d   :  { %177 = vmatmul.mubr.f32.gmra.mrb[4].mxu0 %v32_v18 }
  0x79   :  { %v1501_v36 = vpop.permute.xlu0 %293 }
  0xdf   :  { %v277_v37 = vpop.f32.mrb[0].mxu1 }
  0xe0   :  { %v296_v38 = vadd.f32 %v1501_v36, %v277_v37  ;;  %v1146_v39 = vpop.f32.mrb[1].mxu1 }
  0xe2   :  { %298 = vrot.lane.b32.xlu0 %v296_v38, %s1357_s28 }
  0xf8   :  { %v168_v40 = vpop.f32.mrb[0].mxu0 }
  0xf9   :  { %v170_v41 = vpop.f32.mrb[1].mxu0  ;;  %v169_v43 = vadd.f32 %v1508_v42, %v168_v40 }
  0xfb   :  { %v281_v44 = vadd.f32 %v277_v37, %v169_v43 }
  0xfc   :  { %v173_v61 = vpop.f32.mrb[2].mxu0 }
  0xfd   :  { %v1077_v45 = vmul.f32 -1.442695, %v281_v44  ;;  %v175_v62 = vpop.f32.mrb[3].mxu0  ;;  %v174_v4 = vadd.f32 %v1508_v42, %v173_v61  ;;  %v34_v44 = vld [vmem:[%s1659_s0 + $0x30] sm:$0xff] }
  0xff   :  { %1302 = vpow2.f32 %v1077_v45 }
 0x100   :  { %v178_v25 = vpop.f32.mrb[4].mxu0 }
 0x101   :  { %v180_v26 = vpop.f32.mrb[5].mxu0  ;;  %v179_v31 = vadd.f32 %v1508_v42, %v178_v25 }
 0x109   :  { %v1303_v46 = vpop.eup %1302 }
 0x10a   :  { %v285_v47 = vadd.f32 1.0, %v1303_v46 }
 0x10c   :  { %1304 = vrcp.f32 %v285_v47 }
 0x116   :  { %v1305_v48 = vpop.eup %1304 }
 0x117   :  { %v308_v56 = vsub.f32 1.0, %v1305_v48  ;;  %v314_v58 = vmul.f32 0.0, %v1305_v48 }
 0x154   :  { %v299_v49 = vpop.permute.xlu0 %298 }
 0x155   :  { %v301_v50 = vmul.f32 %v1305_v48, %v299_v49 }
 0x157   :  { %303 = vrot.lane.b32.xlu1 %v301_v50, %s1357_s28 }
 0x1c9   :  { %v304_v51 = vpop.permute.xlu1 %303 }
 0x1ca   :  { %v306_v52 = vadd.f32 %v304_v51, %v169_v43  ;;  %v35_v43 = vld [vmem:[%s1659_s0 + $0x38] sm:$0xff] }
 0x1cb   :  { %1072 = vmatprep.mubr.msk.f32.mxu0 %vm73_vm1, %v35_v43 }
 0x1cc   :  { %1306 = vtanh.f32 %v306_v52  ;;  %182 = vmatmul.mubr.f32.gmra.mrb[6].mxu0 %v34_v44 }
 0x1d6   :  { %v1307_v55 = vpop.eup %1306 }
 0x1d7   :  { %310 = vrot.lane.b32.xlu1 %v1307_v55, %s1358_s4 }
 0x249   :  { %v311_v57 = vpop.permute.xlu1 %310 }
 0x24a   :  { %v313_v59 = vmul.f32 %v311_v57, %v308_v56 }
 0x24c   :  { %v315_v60 = vadd.f32 %v314_v58, %v313_v59 }
 0x24e   :  { %317 = vrot.lane.b32.xlu0 %v315_v60, %s1358_s4 }
 0x29f   :  { %v183_v51 = vpop.f32.mrb[6].mxu0 }
 0x2a0   :  { %v185_v52 = vpop.f32.mrb[7].mxu0  ;;  %v184_v57 = vadd.f32 %v1508_v42, %v183_v51 }
 0x2c0   :  { %v318_v63 = vpop.permute.xlu0 %317 }
 0x2c1   :  { %1156 = vmatmul.mubr.msk.f32.vlgmr.msra.gmra.mrb[2].mxu1 %vm207_vm3, %v318_v63 }
 0x2c2   :  { %1262 = vmatpush3.bf16.msra.mxu1 %v1422_v9  ;;  %1166 = vmatprep.mubr.msk.f32.mxu1 %vm1355_vm0, %v1356_v8 }
 0x2c3   :  { %1263 = vmatprep.subr.bf16.mxu1 %v1354_v0 }
 0x2c6   :  { %1265 = vmatpush3.bf16.msra.mxu1 %v1432_v13 }
 0x2c7   :  { %1266 = vmatprep.subr.bf16.mxu1 %v1354_v0 }
 0x394   :  { %v387_v1 = vpop.f32.mrb[2].mxu1 }
 0x395   :  { %v398_v2 = vadd.f32 %v387_v1, %v1501_v36  ;;  %v1157_v3 = vpop.f32.mrb[3].mxu1  ;;  %v391_v5 = vadd.f32 %v387_v1, %v174_v4 }
 0x397   :  { %400 = vrot.lane.b32.xlu1 %v398_v2, %s1357_s28  ;;  %v1080_v6 = vmul.f32 -1.442695, %v391_v5  ;;  %v36_v5 = vld [vmem:[%s1659_s0 + $0x40] sm:$0xff] }
 0x399   :  { %1308 = vpow2.f32 %v1080_v6 }
 0x3a3   :  { %v1309_v7 = vpop.eup %1308 }
 0x3a4   :  { %v395_v10 = vadd.f32 1.0, %v1309_v7 }
 0x3a6   :  { %1310 = vrcp.f32 %v395_v10 }
 0x3b0   :  { %v1311_v11 = vpop.eup %1310 }
 0x3b1   :  { %v410_v20 = vsub.f32 1.0, %v1311_v11  ;;  %v416_v22 = vmul.f32 %v1311_v11, %v315_v60 }
 0x409   :  { %v401_v12 = vpop.permute.xlu1 %400 }
 0x40a   :  { %v403_v14 = vmul.f32 %v1311_v11, %v401_v12 }
 0x40c   :  { %405 = vrot.lane.b32.xlu0 %v403_v14, %s1357_s28 }
 0x47e   :  { %v406_v15 = vpop.permute.xlu0 %405 }
 0x47f   :  { %v408_v16 = vadd.f32 %v406_v15, %v174_v4  ;;  %v37_v4 = vld [vmem:[%s1659_s0 + $0x48] sm:$0xff] }
 0x480   :  { %1073 = vmatprep.mubr.msk.f32.mxu0 %vm73_vm1, %v37_v4 }
 0x481   :  { %1312 = vtanh.f32 %v408_v16  ;;  %187 = vmatmul.mubr.f32.gmra.mrb[8].mxu0 %v36_v5 }
 0x48b   :  { %v1313_v19 = vpop.eup %1312 }
 0x48c   :  { %412 = vrot.lane.b32.xlu1 %v1313_v19, %s1358_s4 }
 0x4fe   :  { %v413_v21 = vpop.permute.xlu1 %412 }
 0x4ff   :  { %v415_v23 = vmul.f32 %v413_v21, %v410_v20 }
 0x501   :  { %v417_v24 = vadd.f32 %v416_v22, %v415_v23 }
 0x503   :  { %419 = vrot.lane.b32.xlu0 %v417_v24, %s1358_s4 }
 0x554   :  { %v188_v15 = vpop.f32.mrb[8].mxu0 }
 0x555   :  { %v190_v16 = vpop.f32.mrb[9].mxu0  ;;  %v189_v21 = vadd.f32 %v1508_v42, %v188_v15 }
 0x575   :  { %v420_v27 = vpop.permute.xlu0 %419 }
 0x576   :  { %1167 = vmatmul.mubr.msk.f32.vlgmr.msra.gmra.mrb[4].mxu1 %vm207_vm3, %v420_v27 }
 0x577   :  { %1268 = vmatpush3.bf16.msra.mxu1 %v1422_v9  ;;  %1177 = vmatprep.mubr.msk.f32.mxu1 %vm1355_vm0, %v1356_v8 }
 0x578   :  { %1269 = vmatprep.subr.bf16.mxu1 %v1354_v0 }
 0x57b   :  { %1271 = vmatpush3.bf16.msra.mxu1 %v1432_v13 }
 0x57c   :  { %1272 = vmatprep.subr.bf16.mxu1 %v1354_v0 }
 0x649   :  { %v489_v28 = vpop.f32.mrb[4].mxu1 }
 0x64a   :  { %v500_v29 = vadd.f32 %v489_v28, %v1501_v36  ;;  %v1168_v30 = vpop.f32.mrb[5].mxu1  ;;  %v493_v32 = vadd.f32 %v489_v28, %v179_v31 }
 0x64c   :  { %502 = vrot.lane.b32.xlu1 %v500_v29, %s1357_s28  ;;  %v1082_v33 = vmul.f32 -1.442695, %v493_v32  ;;  %v38_v32 = vld [vmem:[%s1659_s0 + $0x50] sm:$0xff] }
 0x64e   :  { %1314 = vpow2.f32 %v1082_v33 }
 0x658   :  { %v1315_v34 = vpop.eup %1314 }
 0x659   :  { %v497_v35 = vadd.f32 1.0, %v1315_v34 }
 0x65b   :  { %1316 = vrcp.f32 %v497_v35 }
 0x665   :  { %v1317_v37 = vpop.eup %1316 }
 0x666   :  { %v512_v46 = vsub.f32 1.0, %v1317_v37  ;;  %v518_v48 = vmul.f32 %v1317_v37, %v417_v24 }
 0x6be   :  { %v503_v38 = vpop.permute.xlu1 %502 }
 0x6bf   :  { %v505_v39 = vmul.f32 %v1317_v37, %v503_v38 }
 0x6c1   :  { %507 = vrot.lane.b32.xlu0 %v505_v39, %s1357_s28 }
 0x733   :  { %v508_v40 = vpop.permute.xlu0 %507 }
 0x734   :  { %v510_v41 = vadd.f32 %v508_v40, %v179_v31  ;;  %v39_v31 = vld [vmem:[%s1659_s0 + $0x58] sm:$0xff] }
 0x735   :  { %1074 = vmatprep.mubr.msk.f32.mxu0 %vm73_vm1, %v39_v31 }
 0x736   :  { %1318 = vtanh.f32 %v510_v41  ;;  %192 = vmatmul.mubr.f32.gmra.mrb[10].mxu0 %v38_v32 }
 0x740   :  { %v1319_v45 = vpop.eup %1318 }
 0x741   :  { %514 = vrot.lane.b32.xlu1 %v1319_v45, %s1358_s4 }
 0x7b3   :  { %v515_v47 = vpop.permute.xlu1 %514 }
 0x7b4   :  { %v517_v49 = vmul.f32 %v515_v47, %v512_v46 }
 0x7b6   :  { %v519_v50 = vadd.f32 %v518_v48, %v517_v49 }
 0x7b8   :  { %521 = vrot.lane.b32.xlu0 %v519_v50, %s1358_s4 }
 0x809   :  { %v193_v40 = vpop.f32.mrb[10].mxu0 }
 0x80a   :  { %v195_v41 = vpop.f32.mrb[11].mxu0  ;;  %v194_v47 = vadd.f32 %v1508_v42, %v193_v40 }
 0x82a   :  { %v522_v53 = vpop.permute.xlu0 %521 }
 0x82b   :  { %1178 = vmatmul.mubr.msk.f32.vlgmr.msra.gmra.mrb[6].mxu1 %vm207_vm3, %v522_v53 }
 0x82c   :  { %1274 = vmatpush3.bf16.msra.mxu1 %v1422_v9  ;;  %1188 = vmatprep.mubr.msk.f32.mxu1 %vm1355_vm0, %v1356_v8 }
 0x82d   :  { %1275 = vmatprep.subr.bf16.mxu1 %v1354_v0 }
 0x830   :  { %1277 = vmatpush3.bf16.msra.mxu1 %v1432_v13 }
 0x831   :  { %1278 = vmatprep.subr.bf16.mxu1 %v1354_v0 }
 0x8fe   :  { %v591_v54 = vpop.f32.mrb[6].mxu1 }
 0x8ff   :  { %v602_v55 = vadd.f32 %v591_v54, %v1501_v36  ;;  %v1179_v56 = vpop.f32.mrb[7].mxu1  ;;  %v595_v58 = vadd.f32 %v591_v54, %v184_v57 }
 0x901   :  { %604 = vrot.lane.b32.xlu1 %v602_v55, %s1357_s28  ;;  %v1084_v59 = vmul.f32 -1.442695, %v595_v58  ;;  %v40_v58 = vld [vmem:[%s1659_s0 + $0x60] sm:$0xff] }
 0x903   :  { %1320 = vpow2.f32 %v1084_v59 }
 0x90d   :  { %v1321_v60 = vpop.eup %1320 }
 0x90e   :  { %v599_v61 = vadd.f32 1.0, %v1321_v60 }
 0x910   :  { %1322 = vrcp.f32 %v599_v61 }
 0x91a   :  { %v1323_v62 = vpop.eup %1322 }
 0x91b   :  { %v614_v7 = vsub.f32 1.0, %v1323_v62  ;;  %v620_v11 = vmul.f32 %v1323_v62, %v519_v50 }
 0x973   :  { %v605_v63 = vpop.permute.xlu1 %604 }
 0x974   :  { %v607_v1 = vmul.f32 %v1323_v62, %v605_v63 }
 0x976   :  { %609 = vrot.lane.b32.xlu0 %v607_v1, %s1357_s28 }
 0x9e8   :  { %v610_v2 = vpop.permute.xlu0 %609 }
 0x9e9   :  { %v612_v3 = vadd.f32 %v610_v2, %v184_v57  ;;  %v41_v57 = vld [vmem:[%s1659_s0 + $0x68] sm:$0xff] }
 0x9ea   :  { %1075 = vmatprep.mubr.msk.f32.mxu0 %vm73_vm1, %v41_v57 }
 0x9eb   :  { %1324 = vtanh.f32 %v612_v3  ;;  %197 = vmatmul.mubr.f32.gmra.mrb[12].mxu0 %v40_v58 }
 0x9f5   :  { %v1325_v6 = vpop.eup %1324 }
 0x9f6   :  { %616 = vrot.lane.b32.xlu1 %v1325_v6, %s1358_s4 }
 0xa68   :  { %v617_v10 = vpop.permute.xlu1 %616 }
 0xa69   :  { %v619_v12 = vmul.f32 %v617_v10, %v614_v7 }
 0xa6b   :  { %v621_v14 = vadd.f32 %v620_v11, %v619_v12 }
 0xa6d   :  { %623 = vrot.lane.b32.xlu0 %v621_v14, %s1358_s4 }
 0xabe   :  { %v198_v2 = vpop.f32.mrb[12].mxu0 }
 0xabf   :  { %v200_v3 = vpop.f32.mrb[13].mxu0  ;;  %v199_v10 = vadd.f32 %v1508_v42, %v198_v2 }
 0xadf   :  { %v624_v17 = vpop.permute.xlu0 %623 }
 0xae0   :  { %1189 = vmatmul.mubr.msk.f32.vlgmr.msra.gmra.mrb[8].mxu1 %vm207_vm3, %v624_v17  ;;  %v43_v17 = vld [vmem:[%s1659_s0 + $0x78] sm:$0xff] }
 0xae1   :  { %1280 = vmatpush3.bf16.msra.mxu1 %v1422_v9  ;;  %1199 = vmatprep.mubr.msk.f32.mxu1 %vm1355_vm0, %v1356_v8 }
 0xae2   :  { %1281 = vmatprep.subr.bf16.mxu1 %v1354_v0  ;;  %1076 = vmatprep.mubr.msk.f32.mxu0 %vm73_vm1, %v43_v17 }
 0xae5   :  { %1283 = vmatpush3.bf16.msra.mxu1 %v1432_v13 }
 0xae6   :  { %1284 = vmatprep.subr.bf16.mxu1 %v1354_v0 }
 0xbb3   :  { %v693_v18 = vpop.f32.mrb[8].mxu1 }
 0xbb4   :  { %v704_v19 = vadd.f32 %v693_v18, %v1501_v36  ;;  %v1190_v20 = vpop.f32.mrb[9].mxu1  ;;  %v697_v22 = vadd.f32 %v693_v18, %v189_v21  ;;  %v42_v18 = vld [vmem:[%s1659_s0 + $0x70] sm:$0xff] }
 0xbb5   :  { %202 = vmatmul.mubr.f32.gmra.mrb[14].mxu0 %v42_v18 }
 0xbb6   :  { %706 = vrot.lane.b32.xlu1 %v704_v19, %s1357_s28  ;;  %v1086_v23 = vmul.f32 -1.442695, %v697_v22 }
 0xbb8   :  { %1326 = vpow2.f32 %v1086_v23 }
 0xbc2   :  { %v1327_v24 = vpop.eup %1326 }
 0xbc3   :  { %v701_v25 = vadd.f32 1.0, %v1327_v24 }
 0xbc5   :  { %1328 = vrcp.f32 %v701_v25 }
 0xbcf   :  { %v1329_v26 = vpop.eup %1328 }
 0xbd0   :  { %v716_v34 = vsub.f32 1.0, %v1329_v26  ;;  %v722_v37 = vmul.f32 %v1329_v26, %v621_v14 }
 0xc28   :  { %v707_v27 = vpop.permute.xlu1 %706 }
 0xc29   :  { %v709_v28 = vmul.f32 %v1329_v26, %v707_v27 }
 0xc2b   :  { %711 = vrot.lane.b32.xlu0 %v709_v28, %s1357_s28 }
 0xc88   :  { %v203_v25 = vpop.f32.mrb[14].mxu0 }
 0xc89   :  { %v205_v26 = vpop.f32.mrb[15].mxu0  ;;  %v204_v31 = vadd.f32 %v1508_v42, %v203_v25 }
 0xc9d   :  { %v712_v29 = vpop.permute.xlu0 %711 }
 0xc9e   :  { %v714_v30 = vadd.f32 %v712_v29, %v189_v21 }
 0xca0   :  { %1330 = vtanh.f32 %v714_v30 }
 0xcaa   :  { %v1331_v33 = vpop.eup %1330 }
 0xcab   :  { %718 = vrot.lane.b32.xlu1 %v1331_v33, %s1358_s4 }
 0xd1d   :  { %v719_v35 = vpop.permute.xlu1 %718 }
 0xd1e   :  { %v721_v38 = vmul.f32 %v719_v35, %v716_v34 }
 0xd20   :  { %v723_v39 = vadd.f32 %v722_v37, %v721_v38 }
 0xd22   :  { %725 = vrot.lane.b32.xlu0 %v723_v39, %s1358_s4 }
 0xd94   :  { %v726_v43 = vpop.permute.xlu0 %725 }
 0xd95   :  { %1200 = vmatmul.mubr.msk.f32.vlgmr.msra.gmra.mrb[10].mxu1 %vm207_vm3, %v726_v43  ;;  %v12_v43 = vstv %s1663_s6 }
 0xd96   :  { %1286 = vmatpush3.bf16.msra.mxu1 %v1422_v9  ;;  %1210 = vmatprep.mubr.msk.f32.mxu1 %vm1355_vm0, %v1356_v8  ;;  %13 = vst [vmem:[#allocation2] sm:$0x1] %v12_v43 }
 0xd97   :  { %1287 = vmatprep.subr.bf16.mxu1 %v1354_v0 }
 0xd9a   :  { %1289 = vmatpush3.bf16.msra.mxu1 %v1432_v13 }
 0xd9b   :  { %1290 = vmatprep.subr.bf16.mxu1 %v1354_v0 }
 0xe68   :  { %v795_v44 = vpop.f32.mrb[10].mxu1 }
 0xe69   :  { %v806_v45 = vadd.f32 %v795_v44, %v1501_v36  ;;  %v1201_v46 = vpop.f32.mrb[11].mxu1  ;;  %v799_v48 = vadd.f32 %v795_v44, %v194_v47 }
 0xe6b   :  { %808 = vrot.lane.b32.xlu1 %v806_v45, %s1357_s28  ;;  %v1088_v49 = vmul.f32 -1.442695, %v799_v48 }
 0xe6d   :  { %1332 = vpow2.f32 %v1088_v49 }
 0xe77   :  { %v1333_v50 = vpop.eup %1332 }
 0xe78   :  { %v803_v51 = vadd.f32 1.0, %v1333_v50 }
 0xe7a   :  { %1334 = vrcp.f32 %v803_v51 }
 0xe84   :  { %v1335_v52 = vpop.eup %1334 }
 0xe85   :  { %v818_v60 = vsub.f32 1.0, %v1335_v52  ;;  %v824_v62 = vmul.f32 %v1335_v52, %v723_v39 }
 0xedd   :  { %v809_v53 = vpop.permute.xlu1 %808 }
 0xede   :  { %v811_v54 = vmul.f32 %v1335_v52, %v809_v53  ;;  %v1094_v53 = vld [vmem:[#allocation2] ss:$0 sm:$0xff] }
 0xee0   :  { %813 = vrot.lane.b32.xlu0 %v811_v54, %s1357_s28 }
 0xf52   :  { %v814_v55 = vpop.permute.xlu0 %813 }
 0xf53   :  { %v816_v56 = vadd.f32 %v814_v55, %v194_v47 }
 0xf55   :  { %1336 = vtanh.f32 %v816_v56 }
 0xf5f   :  { %v1337_v59 = vpop.eup %1336 }
 0xf60   :  { %820 = vrot.lane.b32.xlu1 %v1337_v59, %s1358_s4 }
 0xfd2   :  { %v821_v61 = vpop.permute.xlu1 %820 }
 0xfd3   :  { %v823_v63 = vmul.f32 %v821_v61, %v818_v60 }
 0xfd5   :  { %v825_v1 = vadd.f32 %v824_v62, %v823_v63 }
 0xfd7   :  { %827 = vrot.lane.b32.xlu0 %v825_v1, %s1358_s4 }
0x1049   :  { %v828_v4 = vpop.permute.xlu0 %827 }
0x104a   :  { %1211 = vmatmul.mubr.msk.f32.vlgmr.msra.gmra.mrb[12].mxu1 %vm207_vm3, %v828_v4 }
0x104b   :  { %1292 = vmatpush3.bf16.msra.mxu1 %v1422_v9  ;;  %1221 = vmatprep.mubr.msk.f32.mxu1 %vm1355_vm0, %v1356_v8 }
0x104c   :  { %1293 = vmatprep.subr.bf16.mxu1 %v1354_v0 }
0x104f   :  { %1295 = vmatpush3.bf16.msra.mxu1 %v1432_v13 }
0x111d   :  { %v897_v5 = vpop.f32.mrb[12].mxu1 }
0x111e   :  { %v908_v6 = vadd.f32 %v897_v5, %v1501_v36  ;;  %v1212_v7 = vpop.f32.mrb[13].mxu1  ;;  %v901_v11 = vadd.f32 %v897_v5, %v199_v10 }
0x1120   :  { %910 = vrot.lane.b32.xlu1 %v908_v6, %s1357_s28  ;;  %v1090_v12 = vmul.f32 -1.442695, %v901_v11 }
0x1122   :  { %1338 = vpow2.f32 %v1090_v12 }
0x112c   :  { %v1339_v14 = vpop.eup %1338 }
0x112d   :  { %v905_v9 = vadd.f32 1.0, %v1339_v14 }
0x112f   :  { %1340 = vrcp.f32 %v905_v9 }
0x1139   :  { %v1341_v15 = vpop.eup %1340 }
0x113a   :  { %v920_v20 = vsub.f32 1.0, %v1341_v15  ;;  %v926_v22 = vmul.f32 %v1341_v15, %v825_v1 }
0x1192   :  { %v911_v8 = vpop.permute.xlu1 %910 }
0x1193   :  { %v913_v16 = vmul.f32 %v1341_v15, %v911_v8 }
0x1195   :  { %915 = vrot.lane.b32.xlu0 %v913_v16, %s1357_s28 }
0x1207   :  { %v916_v0 = vpop.permute.xlu0 %915 }
0x1208   :  { %v918_v13 = vadd.f32 %v916_v0, %v199_v10 }
0x120a   :  { %1342 = vtanh.f32 %v918_v13 }
0x1214   :  { %v1343_v19 = vpop.eup %1342 }
0x1215   :  { %922 = vrot.lane.b32.xlu1 %v1343_v19, %s1358_s4 }
0x1287   :  { %v923_v21 = vpop.permute.xlu1 %922 }
0x1288   :  { %v925_v23 = vmul.f32 %v923_v21, %v920_v20 }
0x128a   :  { %v927_v24 = vadd.f32 %v926_v22, %v925_v23 }
0x128c   :  { %929 = vrot.lane.b32.xlu0 %v927_v24, %s1358_s4 }
0x12fe   :  { %v930_v27 = vpop.permute.xlu0 %929 }
0x12ff   :  { %1222 = vmatmul.mubr.msk.f32.vlgmr.msra.gmra.mrb[14].mxu1 %vm207_vm3, %v930_v27 }
0x13d2   :  { %v999_v28 = vpop.f32.mrb[14].mxu1 }
0x13d3   :  { %v1010_v29 = vadd.f32 %v999_v28, %v1501_v36  ;;  %v1223_v30 = vpop.f32.mrb[15].mxu1  ;;  %v1003_v32 = vadd.f32 %v999_v28, %v204_v31  ;;  %v1093_v36 = vld [vmem:[%s1662_s5] ss:$0 sm:$0xff] }
0x13d5   :  { %1012 = vrot.lane.b32.xlu1 %v1010_v29, %s1357_s28  ;;  %v1092_v33 = vmul.f32 -1.442695, %v1003_v32 }
0x13d7   :  { %1344 = vpow2.f32 %v1092_v33 }
0x13e1   :  { %v1345_v34 = vpop.eup %1344 }
0x13e2   :  { %v1007_v35 = vadd.f32 1.0, %v1345_v34 }
0x13e4   :  { %1346 = vrcp.f32 %v1007_v35 }
0x13ee   :  { %v1347_v37 = vpop.eup %1346 }
0x13ef   :  { %v1022_v44 = vsub.f32 1.0, %v1347_v37  ;;  %v1028_v47 = vmul.f32 %v1347_v37, %v927_v24 }
0x1447   :  { %v1013_v38 = vpop.permute.xlu1 %1012 }
0x1448   :  { %v1015_v39 = vmul.f32 %v1347_v37, %v1013_v38 }
0x144a   :  { %1017 = vrot.lane.b32.xlu0 %v1015_v39, %s1357_s28 }
0x144e   :  { %1036 = vrot.lane.b32.xlu0 %v1093_v36, %s1359_s29 }
0x14bc   :  { %v1018_v40 = vpop.permute.xlu0 %1017 }
0x14bd   :  { %v1020_v41 = vadd.f32 %v1018_v40, %v204_v31 }
0x14bf   :  { %1348 = vtanh.f32 %v1020_v41 }
0x14c0   :  { %v1037_v48 = vpop.permute.xlu0 %1036 }
0x14c9   :  { %v1349_v42 = vpop.eup %1348 }
0x14ca   :  { %1024 = vrot.lane.b32.xlu1 %v1349_v42, %s1358_s4 }
0x153c   :  { %v1025_v45 = vpop.permute.xlu1 %1024 }
0x153d   :  { %v1027_v46 = vmul.f32 %v1025_v45, %v1022_v44 }
0x153f   :  { %v1029_v49 = vadd.f32 %v1028_v47, %v1027_v46 }
0x1541   :  { %v1039_v50 = vmul.f32 %v1037_v48, %v1029_v49 }
0x1543   :  { %1041 = vrot.lane.b32.xlu1 %v1039_v50, %s1358_s4 }
0x15b5   :  { %v1042_v51 = vpop.permute.xlu1 %1041 }
0x15b6   :  { %v1044_v52 = vsel %vm207_vm3, %v1042_v51, 0.0 }
0x15b7   :  { %1045 = vadd.xlane.f32.xlu0 %v1044_v52 }
0x1644   :  { %v1046_v54 = vpop.xlane.xlu0 %1045 }
0x1645   :  { %v1054_v55 = vadd.f32 %v1094_v53, %v1046_v54 }
0x1647   :  { %v1095_v56 = vmul.f32 -1.442695, %v1054_v55 }
0x1649   :  { %1350 = vpow2.f32 %v1095_v56 }
0x1653   :  { %v1351_v57 = vpop.eup %1350 }
0x1654   :  { %v1058_v58 = vadd.f32 1.0, %v1351_v57 }
0x1656   :  { %1352 = vrcp.f32 %v1058_v58 }
0x1660   :  { %v1353_v59 = vpop.eup %1352 }
0x1661   :  { %1062 = vst.msk [vmem:[%s1664_s7] sm:$0xff] %vm1061_vm4, %v1353_v59 }

</bundles_post_ra>
